<compile_context>
chip_gen: v7x
topology: tpu7x:2x2x1
jax: 0.10.0
libtpu: 0.0.40
codegen_flags: <defaults>
</compile_context>

<pallas_src>
import jax
import jax.numpy as jnp
from jax.experimental import pallas as pl
from jax.experimental.pallas import tpu as pltpu  # noqa: F401  (TPU memory spaces / params)


def _identity_kernel(x_ref, adj_ref, x_out_ref, adj_out_ref):
    # Outputs are aliased to the inputs at the XLA level, so there is nothing
    # to compute or move.  The body is intentionally a no-op: no vld/vst, no
    # VMEM staging, no DMA — only the custom-call boundary remains.
    del x_ref, adj_ref, x_out_ref, adj_out_ref


def identity_forward(x, adj):
    """Pallas equivalent of Identity.forward(x, adj) -> (x, adj).

    Zero data movement inside the kernel: no grid, no tiling, no HBM<->VMEM
    traffic.  Outputs alias the input buffers; with donated inputs the call
    costs only dispatch overhead on every TPU generation (v5e / v6e / v7x).
    """
    return pl.pallas_call(
        _identity_kernel,
        out_shape=(
            jax.ShapeDtypeStruct(x.shape, x.dtype),
            jax.ShapeDtypeStruct(adj.shape, adj.dtype),
        ),
        in_specs=[
            pl.BlockSpec(memory_space=pl.ANY),   # x stays in HBM, no auto-DMA
            pl.BlockSpec(memory_space=pl.ANY),   # adj stays in HBM, no auto-DMA
        ],
        out_specs=(
            pl.BlockSpec(memory_space=pl.ANY),
            pl.BlockSpec(memory_space=pl.ANY),
        ),
        # The "identity" is realized as buffer aliasing, not a copy.
        input_output_aliases={0: 0, 1: 1},
    )(x, adj)


# Production entry point (per perf review): donate the inputs so the aliasing
# is realized as true buffer reuse (no defensive XLA copies).  Callers must
# not reuse x/adj after this call.
identity_forward_donated = jax.jit(identity_forward, donate_argnums=(0, 1))


if __name__ == "__main__":
    key = jax.random.PRNGKey(0)
    kx, kadj = jax.random.split(key)
    # Small graph-style inputs: 8 nodes, 32 features, 8x8 adjacency.
    x = jax.random.normal(kx, (8, 32), dtype=jnp.float32)
    adj = (jax.random.uniform(kadj, (8, 8)) > 0.5).astype(jnp.float32)

    # Host-side reference snapshot (robust regardless of aliasing/donation).
    x_ref_np = jax.device_get(x)
    adj_ref_np = jax.device_get(adj)

    # Non-donated path for the test (keeps x/adj valid for comparison; XLA
    # inserts the protective copies needed by the aliasing).
    x_out, adj_out = identity_forward(x, adj)
    jax.block_until_ready((x_out, adj_out))

    assert x_out.shape == x_ref_np.shape and x_out.dtype == x_ref_np.dtype
    assert adj_out.shape == adj_ref_np.shape and adj_out.dtype == adj_ref_np.dtype
    assert jnp.array_equal(x_out, x_ref_np)
    assert jnp.array_equal(adj_out, adj_ref_np)
    print("KERNEL_OK")
</pallas_src>

<mosaic_0001>
module attributes {stable_mosaic.version = 11 : i64} {
  func.func @_identity_kernel(%arg0: memref<8x32xf32, #tpu.memory_space<any>>, %arg1: memref<8x8xf32, #tpu.memory_space<any>>, %arg2: memref<8x32xf32, #tpu.memory_space<any>>, %arg3: memref<8x8xf32, #tpu.memory_space<any>>) attributes {dimension_semantics = [], scalar_prefetch = 0 : i64, scratch_operands = 0 : i64, tpu.core_type = #tpu.core_type<tc>} {
    return
  }
}

</mosaic_0001>

<bundles_post_ra>
// kernel: tpu_custom_call.1
= control target key start
LH: loop header
LB: loop body
LE: loop exit
PB: predicated region body
PF: predicated region fallthrough
CT: control target
= control target key end

     0   :  { %s29_s0 = inlined_call_operand.hbm [shape: f32[8,32], index: 0, kind: input, shape index: {}, may-alias: {0,2}]   ;;  %s30_s1 = inlined_call_operand.hbm [shape: f32[8,8], index: 1, kind: input, shape index: {}, may-alias: {1,3}]   ;;  %s31_s2 = inlined_call_operand.hbm [shape: f32[8,32], index: 2, kind: output, shape index: {0}, may-alias: {0,2}]   ;;  %s32_s3 = inlined_call_operand.hbm [shape: f32[8,8], index: 3, kind: output, shape index: {1}, may-alias: {1,3}]  }

</bundles_post_ra>
